<compile_context>
chip_gen: v5e
topology: v5e:2x2
jax: 0.10.0
libtpu: 0.0.40
codegen_flags: <defaults>
</compile_context>

<pallas_src>
import functools

import jax
import jax.numpy as jnp
from jax.experimental import pallas as pl
from jax.experimental.pallas import tpu as pltpu


# --------------------------------------------------------------------------- #
# Helpers
# --------------------------------------------------------------------------- #
def _divisor_candidates(n: int, cap: int, pred):
    """Divisors t of n with t <= cap and pred(t), largest first.

    Falls back to the full extent n (always a legal BlockSpec block size).
    """
    cands = [t for t in range(1, min(n, cap) + 1) if n % t == 0 and pred(t)]
    if not cands:
        cands = [n]
    return sorted(set(cands), reverse=True)


def _col_matrix(tw: int, s_w: int, c: int, dtype):
    """(tw*s_w*c, tw*c) channel-interleaved 0/1 block-sum matrix.

    M[(j*s_w + k)*c + ch, j*c + ch] = 1, zero elsewhere.  Identical for every
    W tile, so one small copy is shared across the whole grid.  Entries are
    exactly representable in bf16, the 1/(s_h*s_w) scale is applied later.
    """
    n_in, n_out = tw * s_w * c, tw * c
    rows = jnp.arange(n_in)[:, None]
    cols = jnp.arange(n_out)[None, :]
    band = ((rows % c) == (cols % c)) & ((rows // (s_w * c)) == (cols // c))
    return band.astype(dtype)


def _row_sum(x_ref, s_h: int, th: int):
    """Sum groups of s_h consecutive rows -> (th, width) f32, on the VPU."""
    if s_h == 1:
        return x_ref[...].astype(jnp.float32)
    acc = x_ref[pl.ds(0, th, stride=s_h), :].astype(jnp.float32)
    for k in range(1, s_h):
        acc = acc + x_ref[pl.ds(k, th, stride=s_h), :].astype(jnp.float32)
    return acc


# --------------------------------------------------------------------------- #
# Kernels
# --------------------------------------------------------------------------- #
def _kernel_rows_only(x_ref, o_ref, *, s_h, th, scale, round_output):
    # x_ref : (TH*s_h, TW*C)   o_ref : (TH, TW*C)      (s_w == 1 path)
    out = _row_sum(x_ref, s_h, th) * jnp.float32(scale)
    if round_output:
        # TODO(synk): cv2 rounds half away from zero for integer images;
        # jnp.round uses round-half-to-even.
        out = jnp.round(out)
    o_ref[...] = out.astype(o_ref.dtype)


def _kernel_rows_cols(x_ref, m_ref, o_ref, *, s_h, th, scale, round_output,
                      mat_dtype):
    # x_ref : (TH*s_h, TW*s_w*C)  m_ref : (TW*s_w*C, TW*C)  o_ref : (TH, TW*C)
    acc = _row_sum(x_ref, s_h, th).astype(mat_dtype)          # bf16 for floats
    out = jnp.dot(acc, m_ref[...], preferred_element_type=jnp.float32)
    out = out * jnp.float32(scale)
    if round_output:
        out = jnp.round(out)
    o_ref[...] = out.astype(o_ref.dtype)


# --------------------------------------------------------------------------- #
# Wrapper
# --------------------------------------------------------------------------- #
@functools.partial(jax.jit, static_argnames=("new_size",))
def resize_area(sample: jnp.ndarray, new_size) -> jnp.ndarray:
    """Pallas equivalent of cv2.resize(sample, new_size, cv2.INTER_AREA).

    sample  : (H, W) or (H, W, C) array (cv2 HWC convention)
    new_size: (W_new, H_new) -- cv2 dsize convention (width first)
    Only integer downscale factors are supported.
    """
    squeeze_channel = sample.ndim == 2
    if squeeze_channel:
        sample = sample[:, :, None]
    if sample.ndim != 3:
        raise NotImplementedError("resize_area expects HW or HWC input")
    H, W, C = sample.shape
    W_new, H_new = new_size

    if H_new > H or W_new > W or H % H_new != 0 or W % W_new != 0:
        # TODO(synk): non-integer ratios and upscaling (cv2 INTER_AREA falls
        # back to bilinear) are not implemented.
        raise NotImplementedError(
            "resize_area only supports integer downscale factors")
    s_h, s_w = H // H_new, W // W_new

    dtype = sample.dtype
    itemsize = jnp.dtype(dtype).itemsize
    round_output = bool(jnp.issubdtype(dtype, jnp.integer))
    # bf16 MXU operands for float images; f32 for integers (exact rounding).
    mat_dtype = jnp.float32 if round_output else jnp.bfloat16
    mat_item = jnp.dtype(mat_dtype).itemsize

    # ---- generation-aware VMEM budget -------------------------------------
    try:
        vmem_cap = int(pltpu.get_tpu_info().vmem_capacity_bytes)
    except Exception:
        vmem_cap = 64 * 1024 * 1024          # conservative (v7x per-TC size)
    budget = int(vmem_cap * 0.45)

    sub_req = 8 * max(1, 4 // itemsize)      # 8 f32, 16 bf16, 32 uint8 rows
    lane_cap = 1024 if s_w == 1 else 512     # bound MXU K / matrix size

    def vmem_usage(th, tw):
        in_blk = th * s_h * tw * s_w * C * itemsize
        out_blk = th * tw * C * itemsize
        mat_blk = (tw * s_w * C) * (tw * C) * mat_item if s_w > 1 else 0
        return 2 * (in_blk + out_blk + mat_blk)   # double-buffered pipeline

    tw_cands = _divisor_candidates(W_new, max(1, lane_cap // C),
                                   lambda t: (t * C) % 128 == 0)
    th_cands = _divisor_candidates(H_new, 512, lambda t: t % sub_req == 0)

    TH, TW = th_cands[-1], tw_cands[-1]      # smallest combo as fallback
    chosen = False
    for tw in tw_cands:                      # widest lane-dense tile first
        for th in th_cands:                  # then tallest that fits budget
            if vmem_usage(th, tw) <= budget:
                TH, TW, chosen = th, tw, True
                break
        if chosen:
            break

    # Give megacore (v7x: 2 TensorCores) at least 2 parallel grid steps.
    if (H_new // TH) * (W_new // TW) == 1:
        for t in range(H_new // 2, 0, -1):
            if H_new % t == 0 and t % sub_req == 0:
                TH = t
                break

    scale = 1.0 / float(s_h * s_w)
    x2d = sample.reshape(H, W * C)           # free reshape: C lane-minor

    grid = (H_new // TH, W_new // TW)
    out_shape = jax.ShapeDtypeStruct((H_new, W_new * C), dtype)

    # Advisory cost estimate: the op is HBM-bound; flops include the banded
    # matmul's (intentionally inflated) MXU work plus the VPU row adds.
    flops = H_new * W * C * max(s_h - 1, 0)
    bytes_accessed = H * W * C * itemsize + H_new * W_new * C * itemsize
    if s_w > 1:
        flops += 2 * H_new * W_new * C * (TW * s_w * C)
        bytes_accessed += (TW * s_w * C) * (TW * C) * mat_item
    cost = pl.CostEstimate(flops=int(flops), transcendentals=0,
                           bytes_accessed=int(bytes_accessed))

    vmem_limit = min(max(vmem_usage(TH, TW) + (8 << 20), 32 << 20),
                     int(vmem_cap * 0.94))
    compiler_params = pltpu.CompilerParams(
        dimension_semantics=("parallel", "parallel"),
        vmem_limit_bytes=int(vmem_limit),
    )

    if s_w == 1:
        # No column reduction: no matrix built, DMA'd, or buffered at all.
        kernel = functools.partial(_kernel_rows_only, s_h=s_h, th=TH,
                                   scale=scale, round_output=round_output)
        out2d = pl.pallas_call(
            kernel,
            out_shape=out_shape,
            grid_spec=pltpu.PrefetchScalarGridSpec(
                num_scalar_prefetch=0,
                grid=grid,
                in_specs=[pl.BlockSpec((TH * s_h, TW * C),
                                       lambda h, w: (h, w))],
                out_specs=pl.BlockSpec((TH, TW * C), lambda h, w: (h, w)),
            ),
            compiler_params=compiler_params,
            cost_estimate=cost,
        )(x2d)
    else:
        col_mat = _col_matrix(TW, s_w, C, mat_dtype)
        kernel = functools.partial(_kernel_rows_cols, s_h=s_h, th=TH,
                                   scale=scale, round_output=round_output,
                                   mat_dtype=mat_dtype)
        out2d = pl.pallas_call(
            kernel,
            out_shape=out_shape,
            grid_spec=pltpu.PrefetchScalarGridSpec(
                num_scalar_prefetch=0,
                grid=grid,
                in_specs=[
                    pl.BlockSpec((TH * s_h, TW * s_w * C),
                                 lambda h, w: (h, w)),
                    # Constant banded matrix, same block every grid step.
                    # TODO(synk): pipeline_mode=pl.Buffered(1) would drop the
                    # redundant second buffer for this constant; kept default
                    # buffering for lowering safety (it is budgeted above).
                    pl.BlockSpec((TW * s_w * C, TW * C), lambda h, w: (0, 0)),
                ],
                out_specs=pl.BlockSpec((TH, TW * C), lambda h, w: (h, w)),
            ),
            compiler_params=compiler_params,
            cost_estimate=cost,
        )(x2d, col_mat)

    out = out2d.reshape(H_new, W_new, C)
    if squeeze_channel:
        out = out[:, :, 0]
    return out


# --------------------------------------------------------------------------- #
# Self-test
# --------------------------------------------------------------------------- #
if __name__ == "__main__":
    key = jax.random.PRNGKey(0)

    # 1) Color (HWC) float image, downscale 2x2 -> bf16 MXU column path.
    H, W, C = 16, 16, 4
    new_size = (8, 8)                      # (W_new, H_new), cv2 convention
    W_new, H_new = new_size
    sh, sw = H // H_new, W // W_new
    x = jax.random.uniform(key, (H, W, C), dtype=jnp.float32)
    out = jax.block_until_ready(resize_area(x, new_size))
    ref = x.reshape(H_new, sh, W_new, sw, C).mean(axis=(1, 3))
    assert out.shape == (H_new, W_new, C), out.shape
    assert out.dtype == x.dtype
    assert jnp.allclose(out, ref, atol=1e-2, rtol=0.0), float(
        jnp.max(jnp.abs(out - ref)))

    # 2) Grayscale (HW) float image, downscale 2x2.
    xg = jax.random.uniform(jax.random.PRNGKey(1), (H, W), dtype=jnp.float32)
    outg = jax.block_until_ready(resize_area(xg, new_size))
    refg = xg.reshape(H_new, sh, W_new, sw).mean(axis=(1, 3))
    assert outg.shape == (H_new, W_new), outg.shape
    assert jnp.allclose(outg, refg, atol=1e-2, rtol=0.0)

    # 3) Height-only downscale (s_w == 1): pure VPU kernel, f32 exact path.
    new_size_h = (16, 8)                   # W_new=16 (unchanged), H_new=8
    outh = jax.block_until_ready(resize_area(x, new_size_h))
    refh = x.reshape(8, 2, 16, C).mean(axis=1)
    assert outh.shape == (8, 16, C), outh.shape
    assert jnp.allclose(outh, refh, atol=1e-6, rtol=0.0)

    # 4) Integer image: exact f32 matmul path + rounding, output dtype kept.
    xi = jax.random.randint(jax.random.PRNGKey(2), (H, W, C), 0, 256,
                            dtype=jnp.int32)
    outi = jax.block_until_ready(resize_area(xi, new_size))
    refi = jnp.round(
        xi.astype(jnp.float32).reshape(H_new, sh, W_new, sw, C).mean(axis=(1, 3))
    ).astype(jnp.int32)
    assert outi.dtype == xi.dtype
    assert bool(jnp.array_equal(outi, refi))

    print("KERNEL_OK")
</pallas_src>

<mosaic_0001>
module attributes {stable_mosaic.version = 11 : i64} {
  func.func @_kernel_rows_cols(%arg0: i32, %arg1: i32, %arg2: memref<16x64xf32, #tpu.memory_space<vmem>>, %arg3: memref<64x32xbf16, #tpu.memory_space<vmem>>, %arg4: memref<8x32xf32, #tpu.memory_space<vmem>>) attributes {dimension_semantics = [#tpu.dimension_semantics<parallel>, #tpu.dimension_semantics<parallel>], iteration_bounds = array<i64: 1, 1>, scalar_prefetch = 0 : i64, scratch_operands = 0 : i64, tpu.core_type = #tpu.core_type<tc>, window_params = [{transform_indices = @transform_0, window_bounds = array<i64: 16, 64>}, {pipeline_mode = #tpu.pipeline_mode<synchronous>, transform_indices = @transform_1, window_bounds = array<i64: 64, 32>}, {transform_indices = @transform_2, window_bounds = array<i64: 8, 32>}]} {
    %c0 = arith.constant 0 : index
    %c0_0 = arith.constant 0 : index
    %0 = tpu.strided_load %arg2[%c0, %c0_0] {strides = array<i32: 2, 1>} : memref<16x64xf32, #tpu.memory_space<vmem>>, vector<8x64xf32>
    %c1 = arith.constant 1 : index
    %c0_1 = arith.constant 0 : index
    %1 = tpu.strided_load %arg2[%c1, %c0_1] {strides = array<i32: 2, 1>} : memref<16x64xf32, #tpu.memory_space<vmem>>, vector<8x64xf32>
    %2 = arith.addf %0, %1 : vector<8x64xf32>
    %3 = arith.truncf %2 : vector<8x64xf32> to vector<8x64xbf16>
    %c0_2 = arith.constant 0 : index
    %c0_3 = arith.constant 0 : index
    %4 = vector.load %arg3[%c0_2, %c0_3] : memref<64x32xbf16, #tpu.memory_space<vmem>>, vector<64x32xbf16>
    %cst = arith.constant dense<0.000000e+00> : vector<8x32xf32>
    %5 = tpu.matmul %3, %4, %cst {dimension_numbers = #tpu.dot_dimension_numbers<[1], [0], [0], [1], [0, 0, 1, 1], [], []>} : vector<8x64xbf16>, vector<64x32xbf16>, vector<8x32xf32> -> vector<8x32xf32>
    %cst_4 = arith.constant 2.500000e-01 : f32
    %6 = vector.broadcast %cst_4 : f32 to vector<8x32xf32>
    %7 = arith.mulf %5, %6 : vector<8x32xf32>
    %c0_5 = arith.constant 0 : index
    %c0_6 = arith.constant 0 : index
    %8 = vector.load %arg4[%c0_5, %c0_6] : memref<8x32xf32, #tpu.memory_space<vmem>>, vector<8x32xf32>
    tpu.vector_store %arg4[%c0_5, %c0_6], %7 {strides = array<i32>} : memref<8x32xf32, #tpu.memory_space<vmem>>, vector<8x32xf32>,
    return
  }
  func.func @transform_0(%arg0: i32, %arg1: i32) -> (i32, i32) {
    %c0_i32 = arith.constant 0 : i32
    return %arg0, %arg1 : i32, i32
  }
  func.func @transform_1(%arg0: i32, %arg1: i32) -> (i32, i32) {
    %c0_i32 = arith.constant 0 : i32
    %c0_i32_0 = arith.constant 0 : i32
    %c0_i32_1 = arith.constant 0 : i32
    return %c0_i32, %c0_i32_0 : i32, i32
  }
  func.func @transform_2(%arg0: i32, %arg1: i32) -> (i32, i32) {
    %c0_i32 = arith.constant 0 : i32
    return %arg0, %arg1 : i32, i32
  }
}

</mosaic_0001>

<bundles_post_ra>
// kernel: resize_area.1
= control target key start
LH: loop header
LB: loop body
LE: loop exit
PB: predicated region body
PF: predicated region fallthrough
CT: control target
= control target key end

     0   :  { %vm49_vm0 = vcmask 523264   ;;  %vm67_vm1 = vcmask 261120   ;;  %s131_s1 = inlined_call_operand.vmem [shape: bf16[64,32], index: 1, kind: input, shape index: {}]   ;;  %s132_s0 = inlined_call_operand.vmem [shape: f32[16,64], index: 0, kind: input, shape index: {}]   ;;  %s133_s2 = inlined_call_operand.vmem [shape: f32[8,32], index: 2, kind: output, shape index: {}]  }
   0x1   :  { %v94_v0 = vld [vmem:[%s131_s1 + $0x18] sm:$0xff]  ;;  %v93_v1 = vld [vmem:[%s131_s1 + $0x10] sm:$0xff]  ;;  %v92_v2 = vld [vmem:[%s131_s1 + $0x8] sm:$0xff] }
   0x2   :  { %57 = vmatpush.bf16.msra.mxu0 %v94_v0  ;;  %v12_v3 = vld [vmem:[%s132_s0] ss:$2 sm:$0xff]  ;;  %v73_v4 = vld [vmem:[%s132_s0 + $0x1] ss:$2 sm:$0xff] }
   0x3   :  { %v15_v5 = vadd.f32 %v73_v4, %v12_v3  ;;  %v91_v6 = vld [vmem:[%s131_s1] sm:$0xff] }
   0x5   :  { %v16_v7 = vpack.c.bf16 %v15_v5, %v15_v5 }
   0x6   :  { %58 = vmatpush.bf16.msra.mxu0 %v93_v1 }
   0xa   :  { %59 = vmatpush.bf16.msra.mxu0 %v92_v2 }
   0xe   :  { %60 = vmatpush.bf16.msra.mxu0 %v91_v6 }
  0x11   :  { %90 = vmatmul.msk.bf16.vlgmr.msra.gmra.mxu0 %vm49_vm0, %v16_v7 }
  0x8e   :  { %v62_v8 = vpop.f32.mrf.mxu0 }
  0x8f   :  { %v66_v9 = vmul.f32 0.25, %v62_v8 }
  0x91   :  { %68 = vst.msk [vmem:[%s133_s2] sm:$0xff] %vm67_vm1, %v66_v9 }
  0x96   :  { %v64_v10 = vpop.f32.mrf.mxu0 }

</bundles_post_ra>
